<compile_context>
chip_gen: v6e
topology: v6e:2x2x1
jax: 0.10.0
libtpu: 0.0.40
codegen_flags: <defaults>
</compile_context>

<pallas_src>
import functools

import jax
import jax.numpy as jnp
from jax.experimental import pallas as pl
from jax.experimental.pallas import tpu as pltpu


def _kpn_kernel(core_ref, frame_ref, out_ref, pad_ref, *, K, H, W, inv_white):
    """Per-(b, n, color) plane kernel-prediction filtering.

    core_ref : (1, K*K, H, W)  per-pixel filter taps (VMEM)
    frame_ref: (1, H, W)       input plane (VMEM)
    out_ref  : (1, H, W)       filtered plane (VMEM)
    pad_ref  : (H+2P, W+2P)    zero-padded scratch plane (VMEM)
    """
    P = K // 2

    # In-kernel zero padding: no padded copy of the frames ever touches HBM.
    pad_ref[...] = jnp.zeros_like(pad_ref)
    pad_ref[P:P + H, P:P + W] = frame_ref[0]

    acc = jnp.zeros((H, W), jnp.float32)
    # 25 shifted multiply-accumulates on the VPU; tap index t = i*K + j matches
    # the img_stack ordering in the PyTorch forward.
    for i in range(K):
        for j in range(K):
            tap = core_ref[0, i * K + j, :, :].astype(jnp.float32)
            acc = acc + tap * pad_ref[i:i + H, j:j + W]

    out_ref[0] = (acc * inv_white).astype(out_ref.dtype)


def kernel_conv_forward(frames, core, *, kernel_size=5, white_level=1.0, rate=1):
    """JAX/Pallas equivalent of KernelConv.forward (default config).

    frames: (B, N, C, H, W) or (B, N, H, W) float32
    core:   (B, N*K*K*C, H, W) float32 (viewed as (B, N, K*K, C, H, W), exactly
            like KernelConv._convert_dict with core_bias=False)
    returns (B, N, H, W) if C == 1 else (B, N, C, H, W)  [matches .squeeze(2)]
    """
    K = int(kernel_size)
    assert rate == 1  # TODO(synk): dilated taps (rate > 1) not implemented.

    if frames.ndim == 4:
        B, N, H, W = frames.shape
        C = 1
        frames = frames.reshape(B, N, C, H, W)
    else:
        B, N, C, H, W = frames.shape

    core = core.reshape(B, N, K * K, C, H, W)

    # Flatten (B, N, C) into M independent planes; bring color next to (B, N)
    # so each plane's K*K taps are contiguous.
    M = B * N * C
    frames_m = frames.reshape(M, H, W)
    core_m = jnp.transpose(core, (0, 1, 3, 2, 4, 5)).reshape(M, K * K, H, W)

    P = K // 2
    kernel = functools.partial(
        _kpn_kernel, K=K, H=H, W=W, inv_white=float(1.0 / white_level))

    out = pl.pallas_call(
        kernel,
        out_shape=jax.ShapeDtypeStruct((M, H, W), frames.dtype),
        grid=(M,),
        in_specs=[
            pl.BlockSpec((1, K * K, H, W), lambda m: (m, 0, 0, 0)),
            pl.BlockSpec((1, H, W), lambda m: (m, 0, 0)),
        ],
        out_specs=pl.BlockSpec((1, H, W), lambda m: (m, 0, 0)),
        scratch_shapes=[pltpu.VMEM((H + 2 * P, W + 2 * P), jnp.float32)],
        compiler_params=pltpu.CompilerParams(
            dimension_semantics=("parallel",)),
    )(core_m, frames_m)

    out = out.reshape(B, N, C, H, W)
    if C == 1:
        out = out.reshape(B, N, H, W)  # matches pred_img_i.squeeze(2)
    return out


# ---------------------------------------------------------------------------
# Pure-JAX reference mirroring the PyTorch forward (correctness check only).
# ---------------------------------------------------------------------------
def _reference(frames, core, kernel_size=5, white_level=1.0):
    K = int(kernel_size)
    if frames.ndim == 4:
        B, N, H, W = frames.shape
        C = 1
        frames = frames.reshape(B, N, C, H, W)
    else:
        B, N, C, H, W = frames.shape
    core = core.reshape(B, N, K * K, C, H, W)

    P = K // 2
    fpad = jnp.pad(frames, ((0, 0), (0, 0), (0, 0), (P, P), (P, P)))
    stack = []
    for i in range(K):
        for j in range(K):
            stack.append(fpad[..., i:i + H, j:j + W])
    img_stack = jnp.stack(stack, axis=2)                 # (B, N, K*K, C, H, W)
    pred = jnp.sum(core * img_stack, axis=2)             # (B, N, C, H, W)
    pred = pred / white_level                            # mean over 1 kernel size = identity
    if C == 1:
        pred = pred.reshape(B, N, H, W)
    return pred


if __name__ == "__main__":
    key = jax.random.PRNGKey(0)
    kf, kc = jax.random.split(key)

    B, N, C, H, W, K = 2, 2, 3, 16, 16, 5
    frames = jax.random.normal(kf, (B, N, C, H, W), jnp.float32)
    # Core as the network would emit it: (B, N*K*K*C, H, W); normalize the
    # K*K taps per pixel (typical KPN output) just to keep values well-scaled.
    core_raw = jax.random.normal(kc, (B, N, K * K, C, H, W), jnp.float32)
    core = jax.nn.softmax(core_raw, axis=2).reshape(B, N * K * K * C, H, W)

    out = kernel_conv_forward(frames, core, kernel_size=K, white_level=1.0)
    out = jax.block_until_ready(out)
    assert out.shape == (B, N, C, H, W), out.shape

    ref = jax.block_until_ready(_reference(frames, core, K, 1.0))
    assert jnp.allclose(out, ref, atol=1e-4, rtol=1e-4), (
        float(jnp.max(jnp.abs(out - ref))))

    print("KERNEL_OK")
</pallas_src>

<mosaic_0001>
module attributes {stable_mosaic.version = 11 : i64} {
  func.func @_kpn_kernel(%arg0: i32, %arg1: memref<1x25x16x16xf32, #tpu.memory_space<vmem>>, %arg2: memref<1x16x16xf32, #tpu.memory_space<vmem>>, %arg3: memref<1x16x16xf32, #tpu.memory_space<vmem>>, %arg4: memref<20x20xf32, #tpu.memory_space<vmem>>) attributes {dimension_semantics = [#tpu.dimension_semantics<parallel>], iteration_bounds = array<i64: 12>, scalar_prefetch = 0 : i64, scratch_operands = 1 : i64, tpu.core_type = #tpu.core_type<tc>, window_params = [{transform_indices = @transform_0, window_bounds = array<i64: 1, 25, 16, 16>}, {transform_indices = @transform_1, window_bounds = array<i64: 1, 16, 16>}, {transform_indices = @transform_2, window_bounds = array<i64: 1, 16, 16>}]} {
    %cst = arith.constant 0.000000e+00 : f32
    %0 = vector.broadcast %cst : f32 to vector<20x20xf32>
    %c0 = arith.constant 0 : index
    %c0_0 = arith.constant 0 : index
    %1 = vector.load %arg4[%c0, %c0_0] : memref<20x20xf32, #tpu.memory_space<vmem>>, vector<20x20xf32>
    tpu.vector_store %arg4[%c0, %c0_0], %0 {strides = array<i32>} : memref<20x20xf32, #tpu.memory_space<vmem>>, vector<20x20xf32>,
    %c0_1 = arith.constant 0 : index
    %c0_2 = arith.constant 0 : index
    %c0_3 = arith.constant 0 : index
    %2 = vector.load %arg2[%c0_1, %c0_2, %c0_3] : memref<1x16x16xf32, #tpu.memory_space<vmem>>, vector<1x16x16xf32>
    %3 = vector.shape_cast %2 : vector<1x16x16xf32> to vector<16x16xf32>
    %c2 = arith.constant 2 : index
    %c2_4 = arith.constant 2 : index
    %4 = vector.load %arg4[%c2, %c2_4] : memref<20x20xf32, #tpu.memory_space<vmem>>, vector<16x16xf32>
    tpu.vector_store %arg4[%c2, %c2_4], %3 {strides = array<i32>} : memref<20x20xf32, #tpu.memory_space<vmem>>, vector<16x16xf32>,
    %cst_5 = arith.constant 0.000000e+00 : f32
    %5 = vector.broadcast %cst_5 : f32 to vector<16x16xf32>
    %c0_6 = arith.constant 0 : index
    %c0_7 = arith.constant 0 : index
    %c0_8 = arith.constant 0 : index
    %c0_9 = arith.constant 0 : index
    %6 = vector.load %arg1[%c0_6, %c0_7, %c0_8, %c0_9] : memref<1x25x16x16xf32, #tpu.memory_space<vmem>>, vector<1x1x16x16xf32>
    %7 = vector.shape_cast %6 : vector<1x1x16x16xf32> to vector<16x16xf32>
    %c0_10 = arith.constant 0 : index
    %c0_11 = arith.constant 0 : index
    %8 = vector.load %arg4[%c0_10, %c0_11] : memref<20x20xf32, #tpu.memory_space<vmem>>, vector<16x16xf32>
    %9 = arith.mulf %7, %8 : vector<16x16xf32>
    %10 = arith.addf %5, %9 : vector<16x16xf32>
    %c0_12 = arith.constant 0 : index
    %c1 = arith.constant 1 : index
    %c0_13 = arith.constant 0 : index
    %c0_14 = arith.constant 0 : index
    %11 = vector.load %arg1[%c0_12, %c1, %c0_13, %c0_14] : memref<1x25x16x16xf32, #tpu.memory_space<vmem>>, vector<1x1x16x16xf32>
    %12 = vector.shape_cast %11 : vector<1x1x16x16xf32> to vector<16x16xf32>
    %c0_15 = arith.constant 0 : index
    %c1_16 = arith.constant 1 : index
    %13 = vector.load %arg4[%c0_15, %c1_16] : memref<20x20xf32, #tpu.memory_space<vmem>>, vector<16x16xf32>
    %14 = arith.mulf %12, %13 : vector<16x16xf32>
    %15 = arith.addf %10, %14 : vector<16x16xf32>
    %c0_17 = arith.constant 0 : index
    %c2_18 = arith.constant 2 : index
    %c0_19 = arith.constant 0 : index
    %c0_20 = arith.constant 0 : index
    %16 = vector.load %arg1[%c0_17, %c2_18, %c0_19, %c0_20] : memref<1x25x16x16xf32, #tpu.memory_space<vmem>>, vector<1x1x16x16xf32>
    %17 = vector.shape_cast %16 : vector<1x1x16x16xf32> to vector<16x16xf32>
    %c0_21 = arith.constant 0 : index
    %c2_22 = arith.constant 2 : index
    %18 = vector.load %arg4[%c0_21, %c2_22] : memref<20x20xf32, #tpu.memory_space<vmem>>, vector<16x16xf32>
    %19 = arith.mulf %17, %18 : vector<16x16xf32>
    %20 = arith.addf %15, %19 : vector<16x16xf32>
    %c0_23 = arith.constant 0 : index
    %c3 = arith.constant 3 : index
    %c0_24 = arith.constant 0 : index
    %c0_25 = arith.constant 0 : index
    %21 = vector.load %arg1[%c0_23, %c3, %c0_24, %c0_25] : memref<1x25x16x16xf32, #tpu.memory_space<vmem>>, vector<1x1x16x16xf32>
    %22 = vector.shape_cast %21 : vector<1x1x16x16xf32> to vector<16x16xf32>
    %c0_26 = arith.constant 0 : index
    %c3_27 = arith.constant 3 : index
    %23 = vector.load %arg4[%c0_26, %c3_27] : memref<20x20xf32, #tpu.memory_space<vmem>>, vector<16x16xf32>
    %24 = arith.mulf %22, %23 : vector<16x16xf32>
    %25 = arith.addf %20, %24 : vector<16x16xf32>
    %c0_28 = arith.constant 0 : index
    %c4 = arith.constant 4 : index
    %c0_29 = arith.constant 0 : index
    %c0_30 = arith.constant 0 : index
    %26 = vector.load %arg1[%c0_28, %c4, %c0_29, %c0_30] : memref<1x25x16x16xf32, #tpu.memory_space<vmem>>, vector<1x1x16x16xf32>
    %27 = vector.shape_cast %26 : vector<1x1x16x16xf32> to vector<16x16xf32>
    %c0_31 = arith.constant 0 : index
    %c4_32 = arith.constant 4 : index
    %28 = vector.load %arg4[%c0_31, %c4_32] : memref<20x20xf32, #tpu.memory_space<vmem>>, vector<16x16xf32>
    %29 = arith.mulf %27, %28 : vector<16x16xf32>
    %30 = arith.addf %25, %29 : vector<16x16xf32>
    %c0_33 = arith.constant 0 : index
    %c5 = arith.constant 5 : index
    %c0_34 = arith.constant 0 : index
    %c0_35 = arith.constant 0 : index
    %31 = vector.load %arg1[%c0_33, %c5, %c0_34, %c0_35] : memref<1x25x16x16xf32, #tpu.memory_space<vmem>>, vector<1x1x16x16xf32>
    %32 = vector.shape_cast %31 : vector<1x1x16x16xf32> to vector<16x16xf32>
    %c1_36 = arith.constant 1 : index
    %c0_37 = arith.constant 0 : index
    %33 = vector.load %arg4[%c1_36, %c0_37] : memref<20x20xf32, #tpu.memory_space<vmem>>, vector<16x16xf32>
    %34 = arith.mulf %32, %33 : vector<16x16xf32>
    %35 = arith.addf %30, %34 : vector<16x16xf32>
    %c0_38 = arith.constant 0 : index
    %c6 = arith.constant 6 : index
    %c0_39 = arith.constant 0 : index
    %c0_40 = arith.constant 0 : index
    %36 = vector.load %arg1[%c0_38, %c6, %c0_39, %c0_40] : memref<1x25x16x16xf32, #tpu.memory_space<vmem>>, vector<1x1x16x16xf32>
    %37 = vector.shape_cast %36 : vector<1x1x16x16xf32> to vector<16x16xf32>
    %c1_41 = arith.constant 1 : index
    %c1_42 = arith.constant 1 : index
    %38 = vector.load %arg4[%c1_41, %c1_42] : memref<20x20xf32, #tpu.memory_space<vmem>>, vector<16x16xf32>
    %39 = arith.mulf %37, %38 : vector<16x16xf32>
    %40 = arith.addf %35, %39 : vector<16x16xf32>
    %c0_43 = arith.constant 0 : index
    %c7 = arith.constant 7 : index
    %c0_44 = arith.constant 0 : index
    %c0_45 = arith.constant 0 : index
    %41 = vector.load %arg1[%c0_43, %c7, %c0_44, %c0_45] : memref<1x25x16x16xf32, #tpu.memory_space<vmem>>, vector<1x1x16x16xf32>
    %42 = vector.shape_cast %41 : vector<1x1x16x16xf32> to vector<16x16xf32>
    %c1_46 = arith.constant 1 : index
    %c2_47 = arith.constant 2 : index
    %43 = vector.load %arg4[%c1_46, %c2_47] : memref<20x20xf32, #tpu.memory_space<vmem>>, vector<16x16xf32>
    %44 = arith.mulf %42, %43 : vector<16x16xf32>
    %45 = arith.addf %40, %44 : vector<16x16xf32>
    %c0_48 = arith.constant 0 : index
    %c8 = arith.constant 8 : index
    %c0_49 = arith.constant 0 : index
    %c0_50 = arith.constant 0 : index
    %46 = vector.load %arg1[%c0_48, %c8, %c0_49, %c0_50] : memref<1x25x16x16xf32, #tpu.memory_space<vmem>>, vector<1x1x16x16xf32>
    %47 = vector.shape_cast %46 : vector<1x1x16x16xf32> to vector<16x16xf32>
    %c1_51 = arith.constant 1 : index
    %c3_52 = arith.constant 3 : index
    %48 = vector.load %arg4[%c1_51, %c3_52] : memref<20x20xf32, #tpu.memory_space<vmem>>, vector<16x16xf32>
    %49 = arith.mulf %47, %48 : vector<16x16xf32>
    %50 = arith.addf %45, %49 : vector<16x16xf32>
    %c0_53 = arith.constant 0 : index
    %c9 = arith.constant 9 : index
    %c0_54 = arith.constant 0 : index
    %c0_55 = arith.constant 0 : index
    %51 = vector.load %arg1[%c0_53, %c9, %c0_54, %c0_55] : memref<1x25x16x16xf32, #tpu.memory_space<vmem>>, vector<1x1x16x16xf32>
    %52 = vector.shape_cast %51 : vector<1x1x16x16xf32> to vector<16x16xf32>
    %c1_56 = arith.constant 1 : index
    %c4_57 = arith.constant 4 : index
    %53 = vector.load %arg4[%c1_56, %c4_57] : memref<20x20xf32, #tpu.memory_space<vmem>>, vector<16x16xf32>
    %54 = arith.mulf %52, %53 : vector<16x16xf32>
    %55 = arith.addf %50, %54 : vector<16x16xf32>
    %c0_58 = arith.constant 0 : index
    %c10 = arith.constant 10 : index
    %c0_59 = arith.constant 0 : index
    %c0_60 = arith.constant 0 : index
    %56 = vector.load %arg1[%c0_58, %c10, %c0_59, %c0_60] : memref<1x25x16x16xf32, #tpu.memory_space<vmem>>, vector<1x1x16x16xf32>
    %57 = vector.shape_cast %56 : vector<1x1x16x16xf32> to vector<16x16xf32>
    %c2_61 = arith.constant 2 : index
    %c0_62 = arith.constant 0 : index
    %58 = vector.load %arg4[%c2_61, %c0_62] : memref<20x20xf32, #tpu.memory_space<vmem>>, vector<16x16xf32>
    %59 = arith.mulf %57, %58 : vector<16x16xf32>
    %60 = arith.addf %55, %59 : vector<16x16xf32>
    %c0_63 = arith.constant 0 : index
    %c11 = arith.constant 11 : index
    %c0_64 = arith.constant 0 : index
    %c0_65 = arith.constant 0 : index
    %61 = vector.load %arg1[%c0_63, %c11, %c0_64, %c0_65] : memref<1x25x16x16xf32, #tpu.memory_space<vmem>>, vector<1x1x16x16xf32>
    %62 = vector.shape_cast %61 : vector<1x1x16x16xf32> to vector<16x16xf32>
    %c2_66 = arith.constant 2 : index
    %c1_67 = arith.constant 1 : index
    %63 = vector.load %arg4[%c2_66, %c1_67] : memref<20x20xf32, #tpu.memory_space<vmem>>, vector<16x16xf32>
    %64 = arith.mulf %62, %63 : vector<16x16xf32>
    %65 = arith.addf %60, %64 : vector<16x16xf32>
    %c0_68 = arith.constant 0 : index
    %c12 = arith.constant 12 : index
    %c0_69 = arith.constant 0 : index
    %c0_70 = arith.constant 0 : index
    %66 = vector.load %arg1[%c0_68, %c12, %c0_69, %c0_70] : memref<1x25x16x16xf32, #tpu.memory_space<vmem>>, vector<1x1x16x16xf32>
    %67 = vector.shape_cast %66 : vector<1x1x16x16xf32> to vector<16x16xf32>
    %c2_71 = arith.constant 2 : index
    %c2_72 = arith.constant 2 : index
    %68 = vector.load %arg4[%c2_71, %c2_72] : memref<20x20xf32, #tpu.memory_space<vmem>>, vector<16x16xf32>
    %69 = arith.mulf %67, %68 : vector<16x16xf32>
    %70 = arith.addf %65, %69 : vector<16x16xf32>
    %c0_73 = arith.constant 0 : index
    %c13 = arith.constant 13 : index
    %c0_74 = arith.constant 0 : index
    %c0_75 = arith.constant 0 : index
    %71 = vector.load %arg1[%c0_73, %c13, %c0_74, %c0_75] : memref<1x25x16x16xf32, #tpu.memory_space<vmem>>, vector<1x1x16x16xf32>
    %72 = vector.shape_cast %71 : vector<1x1x16x16xf32> to vector<16x16xf32>
    %c2_76 = arith.constant 2 : index
    %c3_77 = arith.constant 3 : index
    %73 = vector.load %arg4[%c2_76, %c3_77] : memref<20x20xf32, #tpu.memory_space<vmem>>, vector<16x16xf32>
    %74 = arith.mulf %72, %73 : vector<16x16xf32>
    %75 = arith.addf %70, %74 : vector<16x16xf32>
    %c0_78 = arith.constant 0 : index
    %c14 = arith.constant 14 : index
    %c0_79 = arith.constant 0 : index
    %c0_80 = arith.constant 0 : index
    %76 = vector.load %arg1[%c0_78, %c14, %c0_79, %c0_80] : memref<1x25x16x16xf32, #tpu.memory_space<vmem>>, vector<1x1x16x16xf32>
    %77 = vector.shape_cast %76 : vector<1x1x16x16xf32> to vector<16x16xf32>
    %c2_81 = arith.constant 2 : index
    %c4_82 = arith.constant 4 : index
    %78 = vector.load %arg4[%c2_81, %c4_82] : memref<20x20xf32, #tpu.memory_space<vmem>>, vector<16x16xf32>
    %79 = arith.mulf %77, %78 : vector<16x16xf32>
    %80 = arith.addf %75, %79 : vector<16x16xf32>
    %c0_83 = arith.constant 0 : index
    %c15 = arith.constant 15 : index
    %c0_84 = arith.constant 0 : index
    %c0_85 = arith.constant 0 : index
    %81 = vector.load %arg1[%c0_83, %c15, %c0_84, %c0_85] : memref<1x25x16x16xf32, #tpu.memory_space<vmem>>, vector<1x1x16x16xf32>
    %82 = vector.shape_cast %81 : vector<1x1x16x16xf32> to vector<16x16xf32>
    %c3_86 = arith.constant 3 : index
    %c0_87 = arith.constant 0 : index
    %83 = vector.load %arg4[%c3_86, %c0_87] : memref<20x20xf32, #tpu.memory_space<vmem>>, vector<16x16xf32>
    %84 = arith.mulf %82, %83 : vector<16x16xf32>
    %85 = arith.addf %80, %84 : vector<16x16xf32>
    %c0_88 = arith.constant 0 : index
    %c16 = arith.constant 16 : index
    %c0_89 = arith.constant 0 : index
    %c0_90 = arith.constant 0 : index
    %86 = vector.load %arg1[%c0_88, %c16, %c0_89, %c0_90] : memref<1x25x16x16xf32, #tpu.memory_space<vmem>>, vector<1x1x16x16xf32>
    %87 = vector.shape_cast %86 : vector<1x1x16x16xf32> to vector<16x16xf32>
    %c3_91 = arith.constant 3 : index
    %c1_92 = arith.constant 1 : index
    %88 = vector.load %arg4[%c3_91, %c1_92] : memref<20x20xf32, #tpu.memory_space<vmem>>, vector<16x16xf32>
    %89 = arith.mulf %87, %88 : vector<16x16xf32>
    %90 = arith.addf %85, %89 : vector<16x16xf32>
    %c0_93 = arith.constant 0 : index
    %c17 = arith.constant 17 : index
    %c0_94 = arith.constant 0 : index
    %c0_95 = arith.constant 0 : index
    %91 = vector.load %arg1[%c0_93, %c17, %c0_94, %c0_95] : memref<1x25x16x16xf32, #tpu.memory_space<vmem>>, vector<1x1x16x16xf32>
    %92 = vector.shape_cast %91 : vector<1x1x16x16xf32> to vector<16x16xf32>
    %c3_96 = arith.constant 3 : index
    %c2_97 = arith.constant 2 : index
    %93 = vector.load %arg4[%c3_96, %c2_97] : memref<20x20xf32, #tpu.memory_space<vmem>>, vector<16x16xf32>
    %94 = arith.mulf %92, %93 : vector<16x16xf32>
    %95 = arith.addf %90, %94 : vector<16x16xf32>
    %c0_98 = arith.constant 0 : index
    %c18 = arith.constant 18 : index
    %c0_99 = arith.constant 0 : index
    %c0_100 = arith.constant 0 : index
    %96 = vector.load %arg1[%c0_98, %c18, %c0_99, %c0_100] : memref<1x25x16x16xf32, #tpu.memory_space<vmem>>, vector<1x1x16x16xf32>
    %97 = vector.shape_cast %96 : vector<1x1x16x16xf32> to vector<16x16xf32>
    %c3_101 = arith.constant 3 : index
    %c3_102 = arith.constant 3 : index
    %98 = vector.load %arg4[%c3_101, %c3_102] : memref<20x20xf32, #tpu.memory_space<vmem>>, vector<16x16xf32>
    %99 = arith.mulf %97, %98 : vector<16x16xf32>
    %100 = arith.addf %95, %99 : vector<16x16xf32>
    %c0_103 = arith.constant 0 : index
    %c19 = arith.constant 19 : index
    %c0_104 = arith.constant 0 : index
    %c0_105 = arith.constant 0 : index
    %101 = vector.load %arg1[%c0_103, %c19, %c0_104, %c0_105] : memref<1x25x16x16xf32, #tpu.memory_space<vmem>>, vector<1x1x16x16xf32>
    %102 = vector.shape_cast %101 : vector<1x1x16x16xf32> to vector<16x16xf32>
    %c3_106 = arith.constant 3 : index
    %c4_107 = arith.constant 4 : index
    %103 = vector.load %arg4[%c3_106, %c4_107] : memref<20x20xf32, #tpu.memory_space<vmem>>, vector<16x16xf32>
    %104 = arith.mulf %102, %103 : vector<16x16xf32>
    %105 = arith.addf %100, %104 : vector<16x16xf32>
    %c0_108 = arith.constant 0 : index
    %c20 = arith.constant 20 : index
    %c0_109 = arith.constant 0 : index
    %c0_110 = arith.constant 0 : index
    %106 = vector.load %arg1[%c0_108, %c20, %c0_109, %c0_110] : memref<1x25x16x16xf32, #tpu.memory_space<vmem>>, vector<1x1x16x16xf32>
    %107 = vector.shape_cast %106 : vector<1x1x16x16xf32> to vector<16x16xf32>
    %c4_111 = arith.constant 4 : index
    %c0_112 = arith.constant 0 : index
    %108 = vector.load %arg4[%c4_111, %c0_112] : memref<20x20xf32, #tpu.memory_space<vmem>>, vector<16x16xf32>
    %109 = arith.mulf %107, %108 : vector<16x16xf32>
    %110 = arith.addf %105, %109 : vector<16x16xf32>
    %c0_113 = arith.constant 0 : index
    %c21 = arith.constant 21 : index
    %c0_114 = arith.constant 0 : index
    %c0_115 = arith.constant 0 : index
    %111 = vector.load %arg1[%c0_113, %c21, %c0_114, %c0_115] : memref<1x25x16x16xf32, #tpu.memory_space<vmem>>, vector<1x1x16x16xf32>
    %112 = vector.shape_cast %111 : vector<1x1x16x16xf32> to vector<16x16xf32>
    %c4_116 = arith.constant 4 : index
    %c1_117 = arith.constant 1 : index
    %113 = vector.load %arg4[%c4_116, %c1_117] : memref<20x20xf32, #tpu.memory_space<vmem>>, vector<16x16xf32>
    %114 = arith.mulf %112, %113 : vector<16x16xf32>
    %115 = arith.addf %110, %114 : vector<16x16xf32>
    %c0_118 = arith.constant 0 : index
    %c22 = arith.constant 22 : index
    %c0_119 = arith.constant 0 : index
    %c0_120 = arith.constant 0 : index
    %116 = vector.load %arg1[%c0_118, %c22, %c0_119, %c0_120] : memref<1x25x16x16xf32, #tpu.memory_space<vmem>>, vector<1x1x16x16xf32>
    %117 = vector.shape_cast %116 : vector<1x1x16x16xf32> to vector<16x16xf32>
    %c4_121 = arith.constant 4 : index
    %c2_122 = arith.constant 2 : index
    %118 = vector.load %arg4[%c4_121, %c2_122] : memref<20x20xf32, #tpu.memory_space<vmem>>, vector<16x16xf32>
    %119 = arith.mulf %117, %118 : vector<16x16xf32>
    %120 = arith.addf %115, %119 : vector<16x16xf32>
    %c0_123 = arith.constant 0 : index
    %c23 = arith.constant 23 : index
    %c0_124 = arith.constant 0 : index
    %c0_125 = arith.constant 0 : index
    %121 = vector.load %arg1[%c0_123, %c23, %c0_124, %c0_125] : memref<1x25x16x16xf32, #tpu.memory_space<vmem>>, vector<1x1x16x16xf32>
    %122 = vector.shape_cast %121 : vector<1x1x16x16xf32> to vector<16x16xf32>
    %c4_126 = arith.constant 4 : index
    %c3_127 = arith.constant 3 : index
    %123 = vector.load %arg4[%c4_126, %c3_127] : memref<20x20xf32, #tpu.memory_space<vmem>>, vector<16x16xf32>
    %124 = arith.mulf %122, %123 : vector<16x16xf32>
    %125 = arith.addf %120, %124 : vector<16x16xf32>
    %c0_128 = arith.constant 0 : index
    %c24 = arith.constant 24 : index
    %c0_129 = arith.constant 0 : index
    %c0_130 = arith.constant 0 : index
    %126 = vector.load %arg1[%c0_128, %c24, %c0_129, %c0_130] : memref<1x25x16x16xf32, #tpu.memory_space<vmem>>, vector<1x1x16x16xf32>
    %127 = vector.shape_cast %126 : vector<1x1x16x16xf32> to vector<16x16xf32>
    %c4_131 = arith.constant 4 : index
    %c4_132 = arith.constant 4 : index
    %128 = vector.load %arg4[%c4_131, %c4_132] : memref<20x20xf32, #tpu.memory_space<vmem>>, vector<16x16xf32>
    %129 = arith.mulf %127, %128 : vector<16x16xf32>
    %130 = arith.addf %125, %129 : vector<16x16xf32>
    %cst_133 = arith.constant 1.000000e+00 : f32
    %131 = vector.broadcast %cst_133 : f32 to vector<16x16xf32>
    %132 = arith.mulf %130, %131 : vector<16x16xf32>
    %c0_134 = arith.constant 0 : index
    %c0_135 = arith.constant 0 : index
    %c0_136 = arith.constant 0 : index
    %133 = vector.load %arg3[%c0_134, %c0_135, %c0_136] : memref<1x16x16xf32, #tpu.memory_space<vmem>>, vector<1x16x16xf32>
    %134 = vector.shape_cast %133 : vector<1x16x16xf32> to vector<16x16xf32>
    %135 = vector.shape_cast %132 : vector<16x16xf32> to vector<1x16x16xf32>
    tpu.vector_store %arg3[%c0_134, %c0_135, %c0_136], %135 {strides = array<i32>} : memref<1x16x16xf32, #tpu.memory_space<vmem>>, vector<1x16x16xf32>,
    return
  }
  func.func @transform_0(%arg0: i32) -> (i32, i32, i32, i32) {
    %c0_i32 = arith.constant 0 : i32
    %c0_i32_0 = arith.constant 0 : i32
    %c0_i32_1 = arith.constant 0 : i32
    %c0_i32_2 = arith.constant 0 : i32
    return %arg0, %c0_i32, %c0_i32_0, %c0_i32_1 : i32, i32, i32, i32
  }
  func.func @transform_1(%arg0: i32) -> (i32, i32, i32) {
    %c0_i32 = arith.constant 0 : i32
    %c0_i32_0 = arith.constant 0 : i32
    %c0_i32_1 = arith.constant 0 : i32
    return %arg0, %c0_i32, %c0_i32_0 : i32, i32, i32
  }
  func.func @transform_2(%arg0: i32) -> (i32, i32, i32) {
    %c0_i32 = arith.constant 0 : i32
    %c0_i32_0 = arith.constant 0 : i32
    %c0_i32_1 = arith.constant 0 : i32
    return %arg0, %c0_i32, %c0_i32_0 : i32, i32, i32
  }
}

</mosaic_0001>

<bundles_post_ra>
// kernel: tpu_custom_call.1
= control target key start
LH: loop header
LB: loop body
LE: loop exit
PB: predicated region body
PF: predicated region fallthrough
CT: control target
= control target key end

     0   :  { %7 = vsyncpa [#allocation4], 0  ;;  %s1020_s0 = inlined_call_operand.vmem [shape: f32[12,25,16,16], index: 0, kind: input, shape index: {}]   ;;  %s1021_s1 = inlined_call_operand.vmem [shape: f32[12,16,16], index: 1, kind: input, shape index: {}]   ;;  %s1022_s2 = inlined_call_operand.hbm [shape: f32[12,16,16], index: 2, kind: output, shape index: {}]  }
   0x1   :  { %9 = vsyncpa [#allocation4 + $0x1], 0  ;;  %s782_s9 = smov 0   ;;  %s784_s10 = smov 0  }
   0x2   :  { %s786_s11 = smov 0   ;;  %s788_s12 = smov 0  }
   0x3 LB: > { %s803_s13 = sadd.s32 4294967295, %s756_s12   ;;  %s585_s14 = sadd.s32 4294967294, %s756_s12   ;;  %s756_s12 = sphi %s788_s12, %s1028_s12   ;;  %s752_s11 = sphi %s786_s11, %s1027_s11   ;;  %s748_s10 = sphi %s784_s10, %s1026_s10   ;;  %s744_s9 = sphi %s782_s9, %s1025_s9  }
   0x4   : > { %s807_s15 = sadd.s32 1, %s756_s12   ;;  %s74_s16 = sadd.s32 1, %s752_s11 }
   0x5   : > { %s71_s17 = ssub.s32 %s756_s12, %s807_s15  ;;  %p84_p0 = scmp.ne.s32.totalorder %s752_s11, %s748_s10 }
   0x6   : > { %p72_p1 = scmp.eq.s32.totalorder %s71_s17, 0  ;;  %p85_p2 = scmp.eq.s32.totalorder %s803_s13, 11 }
   0x7   : > { %p90_p3 = scmp.ne.s32.totalorder %s748_s10, %s744_s9  ;;  %p91_p4 = scmp.eq.s32.totalorder %s585_s14, 11 }
   0x8   : > { %s818_s18 = scalar_select %p72_p1, %s752_s11, %s74_s16  }
   0x9   : > { %p820_p5 = por %p85_p2, %p84_p0  ;;  %p824_p6 = por %p91_p4, %p90_p3 }
   0xa   : > { %p588_p7 = scmp.ge.s32.totalorder %s756_s12, 1  ;;  %p125_p8 = scmp.lt.s32.totalorder %s756_s12, 13 }
   0xc   : > { %p126_p9 = pnand %p588_p7, %p125_p8 }
   0xd   : > { %p152_p10 = scmp.lt.s32.totalorder (!%p126_p9), %s803_s13, 11  ;;  %s759_s26 = smov (!%p126_p9), 2  }
   0xe   : > { %129 = sbr.rel (%p126_p9) target bundleno = 360 (0x168), region = 28  ;;  %s760_s3 = smov (!%p126_p9), 126  }
   0xf   : > { %s761_s4 = smov (!%p126_p9), 127   ;;  %s762_s5 = smov (!%p126_p9), 125  }
  0x10   : > { %s763_s6 = smov (!%p126_p9), 124   ;;  %s149_s7 = sand.u32 (!%p126_p9), 1, %s748_s10  }
  0x11   : > { %s589_s8 = sshll.u32 (!%p126_p9), %s149_s7, 4  ;;  %s647_s17 = sshll.u32 (!%p126_p9), %s803_s13, 8 }
  0x12   : > { %s151_s14 = scalar_lea.vmem (!%p126_p9), [#allocation3], %s589_s8  ;;  %s973_s23 = scalar_lea.hbm (!%p126_p9), %s1022_s2, %s647_s17 }
  0x13   : > { %vm162_vm0 = vcmask 162816   ;;  %vm165_vm1 = vcmask 158720   ;;  %v758_v0 = vmov 0.0   ;;  %s153_s21 = scalar_select %p152_p10, %s803_s13, 11  ;;  %vm177_vm2 = vcmask 146448  }
  0x14   : > { %163 = vst.msk [vmem:[#allocation2] sm:$0xff] %vm162_vm0, %v758_v0  ;;  %164 = vst.msk [vmem:[#allocation2 + $0x8] sm:$0xff] %vm162_vm0, %v758_v0  ;;  %vm494_vm3 = vcmask 130048   ;;  %s511_s16 = sshll.u32 %s151_s14, 4  ;;  %s980_s24 = scalar_lea.sflag [#allocation4], %s149_s7  ;;  %s975_s16 = int_to_ptr.vmem [resolvable:$true] %s511_s16 }
  0x15   : > { %166 = vst.msk [vmem:[#allocation2 + $0x10] sm:$0xf] %vm165_vm1, %v758_v0  ;;  %s646_s22 = sshll.u32 %s153_s21, 4  ;;  %s648_s27 = smul.u32 400, %s153_s21 }
  0x16   : > { %s161_s25 = scalar_lea.vmem %s1021_s1, %s646_s22  ;;  %s764_s13 = smov [#allocation3]  }
  0x17   : > { %v167_v1 = vld [vmem:[%s161_s25] sm:$0xff]  ;;  %v168_v2 = vld [vmem:[%s161_s25 + $0x8] sm:$0xff]  ;;  %s838_s30 = scalar_lea.vmem %s1020_s0, %s648_s27  ;;  %s696_s25 = scalar_lea.vmem %s975_s16, 256 }
  0x18   : > { %171 = vrot.lane.b32.xlu0 %v167_v1, %s759_s26  ;;  %v180_v5 = vld [vmem:[%s838_s30] sm:$0xff]  ;;  %v601_v6 = vld [vmem:[%s838_s30 + $0x50] sm:$0xff]  ;;  %v181_v14 = vld [vmem:[%s838_s30 + $0x8] sm:$0xff]  ;;  %p697_p11 = scmp.ne.s32.totalorder %s975_s16, %s696_s25 }
  0x19   : > { %v611_v7 = vld [vmem:[%s838_s30 + $0xa0] sm:$0xff]  ;;  %v602_v15 = vld [vmem:[%s838_s30 + $0x58] sm:$0xff]  ;;  %v612_v16 = vld [vmem:[%s838_s30 + $0xa8] sm:$0xff] }
  0x1a   : > { %v621_v17 = vld [vmem:[%s838_s30 + $0xf0] sm:$0xff]  ;;  %v622_v18 = vld [vmem:[%s838_s30 + $0xf8] sm:$0xff]  ;;  %v595_v34 = vld [vmem:[%s838_s30 + $0x20] sm:$0xff]  ;;  %p698_p12 = pnand %p697_p11, %p820_p5 }
  0x1b   : > { %v593_v31 = vld [vmem:[%s838_s30 + $0x10] sm:$0xff]  ;;  %v594_v36 = vld [vmem:[%s838_s30 + $0x18] sm:$0xff]  ;;  %v596_v45 = vld [vmem:[%s838_s30 + $0x28] sm:$0xff] }
  0x1c   : > { %173 = vrot.lane.b32.xlu0 %v168_v2, %s759_s26  ;;  %v597_v37 = vld [vmem:[%s838_s30 + $0x30] sm:$0xff]  ;;  %v599_v46 = vld [vmem:[%s838_s30 + $0x40] sm:$0xff]  ;;  %v598_v53 = vld [vmem:[%s838_s30 + $0x38] sm:$0xff]  ;;  %p699_p13 = pneg %p698_p12  ;;  %s700_s26 = sshll.u32 %s764_s13, 4  ;;  %s701_s26 = int_to_ptr.vmem [resolvable:$false] %s700_s26 }
  0x1d   : > { %v603_v54 = vld [vmem:[%s838_s30 + $0x60] sm:$0xff]  ;;  %v600_v62 = vld [vmem:[%s838_s30 + $0x48] sm:$0xff]  ;;  %v605_v63 = vld [vmem:[%s838_s30 + $0x70] sm:$0xff]  ;;  %s702_s27 = scalar_lea.vmem %s701_s26, 512  ;;  %p703_p0 = scmp.lt.s32.totalorder %s975_s16, %s701_s26 }
  0x1e   : > { %p704_p1 = scmp.lt.s32.totalorder %s702_s27, %s696_s25 }
  0x20   : > { %p705_p2 = por %p704_p1, %p703_p0 }
  0x22   : > { %p706_p3 = pnand %p705_p2, %p699_p13 }
  0x8a   : > { %v172_v3 = vpop.permute.xlu0 %171 }
  0x8b   : > { %178 = vst.msk [vmem:[#allocation2 + $0x2] sm:$0xff] %vm177_vm2, %v172_v3 }
  0x8e   : > { %v174_v4 = vpop.permute.xlu0 %173 }
  0x8f   : > { %179 = vst.msk [vmem:[#allocation2 + $0xa] sm:$0xff] %vm177_vm2, %v174_v4 }
  0x92   : > { %v182_v8 = vld [vmem:[#allocation2] sm:$0xff] }
  0x93   : > { %v245_v9 = vld [vmem:[#allocation2 + $0x1] sm:$0xff]  ;;  %206 = vrot.lane.b32.xlu0 %v182_v8, %s760_s3  ;;  %193 = vrot.lane.b32.xlu1 %v182_v8, %s761_s4  ;;  %v845_v11 = vmul.f32 %v182_v8, %v180_v5 }
  0x94   : > { %v308_v10 = vld [vmem:[#allocation2 + $0x2] sm:$0xff]  ;;  %v847_v12 = vmul.f32 %v601_v6, %v245_v9 }
  0x95   : > { %v849_v13 = vmul.f32 %v611_v7, %v308_v10  ;;  %v604_v6 = vld [vmem:[%s838_s30 + $0x68] sm:$0xff]  ;;  %v607_v7 = vld [vmem:[%s838_s30 + $0x80] sm:$0xff] }
  0x96   : > { %v183_v19 = vld [vmem:[#allocation2 + $0x8] sm:$0xff] }
  0x97   : > { %v246_v20 = vld [vmem:[#allocation2 + $0x9] sm:$0xff]  ;;  %219 = vrot.lane.b32.xlu0 %v182_v8, %s762_s5  ;;  %195 = vrot.lane.b32.xlu1 %v183_v19, %s761_s4  ;;  %v185_v24 = vmul.f32 %v183_v19, %v181_v14 }
  0x98   : > { %v309_v21 = vld [vmem:[#allocation2 + $0xa] sm:$0xff]  ;;  %v858_v25 = vmul.f32 %v602_v15, %v246_v20 }
  0x99   : > { %v371_v22 = vld [vmem:[#allocation2 + $0x3] sm:$0xff]  ;;  %v372_v23 = vld [vmem:[#allocation2 + $0xb] sm:$0xff]  ;;  %v860_v26 = vmul.f32 %v612_v16, %v309_v21  ;;  %v606_v16 = vld [vmem:[%s838_s30 + $0x78] sm:$0xff] }
  0x9a   : > { %v862_v27 = vmul.f32 %v621_v17, %v371_v22  ;;  %v864_v28 = vmul.f32 %v622_v18, %v372_v23  ;;  %v892_v29 = vld [vmem:[#allocation2 + $0x4] sm:$0xff]  ;;  %v900_v30 = vld [vmem:[#allocation2 + $0xc] sm:$0xff] }
  0x9b   : > { %232 = vrot.lane.b32.xlu0 %v182_v8, %s763_s6  ;;  %208 = vrot.lane.b32.xlu1 %v183_v19, %s760_s3  ;;  %v609_v17 = vld [vmem:[%s838_s30 + $0x90] sm:$0xff] }
  0x9f   : > { %256 = vrot.lane.b32.xlu0 %v245_v9, %s761_s4  ;;  %221 = vrot.lane.b32.xlu1 %v183_v19, %s762_s5 }
  0xa3   : > { %269 = vrot.lane.b32.xlu0 %v245_v9, %s760_s3  ;;  %234 = vrot.lane.b32.xlu1 %v183_v19, %s763_s6 }
  0xa7   : > { %282 = vrot.lane.b32.xlu0 %v245_v9, %s762_s5  ;;  %258 = vrot.lane.b32.xlu1 %v246_v20, %s761_s4 }
  0xab   : > { %295 = vrot.lane.b32.xlu0 %v245_v9, %s763_s6  ;;  %271 = vrot.lane.b32.xlu1 %v246_v20, %s760_s3 }
  0xaf   : > { %319 = vrot.lane.b32.xlu0 %v308_v10, %s761_s4  ;;  %284 = vrot.lane.b32.xlu1 %v246_v20, %s762_s5 }
  0xb3   : > { %332 = vrot.lane.b32.xlu0 %v308_v10, %s760_s3  ;;  %297 = vrot.lane.b32.xlu1 %v246_v20, %s763_s6 }
  0xb7   : > { %345 = vrot.lane.b32.xlu0 %v308_v10, %s762_s5  ;;  %321 = vrot.lane.b32.xlu1 %v309_v21, %s761_s4 }
  0xbb   : > { %358 = vrot.lane.b32.xlu0 %v308_v10, %s763_s6  ;;  %334 = vrot.lane.b32.xlu1 %v309_v21, %s760_s3 }
  0xbf   : > { %382 = vrot.lane.b32.xlu0 %v371_v22, %s761_s4  ;;  %347 = vrot.lane.b32.xlu1 %v309_v21, %s762_s5 }
  0xc3   : > { %395 = vrot.lane.b32.xlu0 %v371_v22, %s760_s3  ;;  %360 = vrot.lane.b32.xlu1 %v309_v21, %s763_s6 }
  0xc7   : > { %408 = vrot.lane.b32.xlu0 %v371_v22, %s762_s5  ;;  %384 = vrot.lane.b32.xlu1 %v372_v23, %s761_s4 }
  0xcb   : > { %421 = vrot.lane.b32.xlu0 %v371_v22, %s763_s6  ;;  %397 = vrot.lane.b32.xlu1 %v372_v23, %s760_s3 }
  0xcf   : > { %445 = vrot.lane.b32.xlu0 %v892_v29, %s761_s4  ;;  %410 = vrot.lane.b32.xlu1 %v372_v23, %s762_s5 }
  0xd3   : > { %458 = vrot.lane.b32.xlu0 %v892_v29, %s760_s3  ;;  %423 = vrot.lane.b32.xlu1 %v372_v23, %s763_s6 }
  0xd7   : > { %471 = vrot.lane.b32.xlu0 %v892_v29, %s762_s5  ;;  %447 = vrot.lane.b32.xlu1 %v900_v30, %s761_s4 }
  0xdb   : > { %484 = vrot.lane.b32.xlu0 %v892_v29, %s763_s6  ;;  %460 = vrot.lane.b32.xlu1 %v900_v30, %s760_s3 }
  0xdf   : > { %473 = vrot.lane.b32.xlu1 %v900_v30, %s762_s5 }
  0xe3   : > { %486 = vrot.lane.b32.xlu1 %v900_v30, %s763_s6 }
 0x105   : > { %v194_v32 = vpop.permute.xlu1 %193  ;;  %v207_v33 = vpop.permute.xlu0 %206 }
 0x106   : > { %v199_v35 = vmul.f32 %v593_v31, %v194_v32  ;;  %v212_v39 = vmul.f32 %v595_v34, %v207_v33  ;;  %v613_v31 = vld [vmem:[%s838_s30 + $0xb0] sm:$0xff] }
 0x108   : > { %v201_v38 = vadd.f32 %v199_v35, %v845_v11 }
 0x109   : > { %v196_v40 = vpop.permute.xlu1 %195  ;;  %v220_v41 = vpop.permute.xlu0 %219 }
 0x10a   : > { %v214_v42 = vadd.f32 %v212_v39, %v201_v38  ;;  %v200_v43 = vmul.f32 %v594_v36, %v196_v40  ;;  %v225_v44 = vmul.f32 %v597_v37, %v220_v41  ;;  %v610_v38 = vld [vmem:[%s838_s30 + $0x98] sm:$0xff]  ;;  %v615_v39 = vld [vmem:[%s838_s30 + $0xc0] sm:$0xff] }
 0x10c   : > { %v202_v47 = vadd.f32 %v200_v43, %v185_v24  ;;  %v227_v48 = vadd.f32 %v225_v44, %v214_v42  ;;  %v608_v24 = vld [vmem:[%s838_s30 + $0x88] sm:$0xff] }
 0x10d   : > { %v209_v49 = vpop.permute.xlu1 %208  ;;  %v233_v50 = vpop.permute.xlu0 %232 }
 0x10e   : > { %v213_v51 = vmul.f32 %v596_v45, %v209_v49  ;;  %v238_v52 = vmul.f32 %v599_v46, %v233_v50  ;;  %v614_v46 = vld [vmem:[%s838_s30 + $0xb8] sm:$0xff] }
 0x110   : > { %v215_v55 = vadd.f32 %v213_v51, %v202_v47  ;;  %v240_v56 = vadd.f32 %v238_v52, %v227_v48  ;;  %v617_v47 = vld [vmem:[%s838_s30 + $0xd0] sm:$0xff] }
 0x111   : > { %v222_v57 = vpop.permute.xlu1 %221  ;;  %v257_v58 = vpop.permute.xlu0 %256 }
 0x112   : > { %v226_v59 = vmul.f32 %v598_v53, %v222_v57  ;;  %v249_v60 = vadd.f32 %v847_v12, %v240_v56  ;;  %v262_v61 = vmul.f32 %v603_v54, %v257_v58  ;;  %v616_v54 = vld [vmem:[%s838_s30 + $0xc8] sm:$0xff] }
 0x114   : > { %v228_v0 = vadd.f32 %v226_v59, %v215_v55  ;;  %v264_v1 = vadd.f32 %v262_v61, %v249_v60  ;;  %v619_v55 = vld [vmem:[%s838_s30 + $0xe0] sm:$0xff] }
 0x115   : > { %v235_v2 = vpop.permute.xlu1 %234  ;;  %v270_v3 = vpop.permute.xlu0 %269 }
 0x116   : > { %v239_v4 = vmul.f32 %v600_v62, %v235_v2  ;;  %v275_v5 = vmul.f32 %v605_v63, %v270_v3  ;;  %v618_v62 = vld [vmem:[%s838_s30 + $0xd8] sm:$0xff]  ;;  %v623_v63 = vld [vmem:[%s838_s30 + $0x100] sm:$0xff] }
 0x118   : > { %v241_v8 = vadd.f32 %v239_v4, %v228_v0  ;;  %v277_v9 = vadd.f32 %v275_v5, %v264_v1 }
 0x119   : > { %v259_v10 = vpop.permute.xlu1 %258  ;;  %v283_v11 = vpop.permute.xlu0 %282 }
 0x11a   : > { %v250_v12 = vadd.f32 %v858_v25, %v241_v8  ;;  %v263_v14 = vmul.f32 %v604_v6, %v259_v10  ;;  %v288_v15 = vmul.f32 %v607_v7, %v283_v11  ;;  %v620_v6 = vld [vmem:[%s838_s30 + $0xe8] sm:$0xff]  ;;  %v625_v7 = vld [vmem:[%s838_s30 + $0x110] sm:$0xff] }
 0x11c   : > { %v265_v18 = vadd.f32 %v263_v14, %v250_v12  ;;  %v290_v19 = vadd.f32 %v288_v15, %v277_v9  ;;  %v624_v15 = vld [vmem:[%s838_s30 + $0x108] sm:$0xff] }
 0x11d   : > { %v272_v20 = vpop.permute.xlu1 %271  ;;  %v296_v21 = vpop.permute.xlu0 %295 }
 0x11e   : > { %v276_v22 = vmul.f32 %v606_v16, %v272_v20  ;;  %v301_v23 = vmul.f32 %v609_v17, %v296_v21  ;;  %v627_v16 = vld [vmem:[%s838_s30 + $0x120] sm:$0xff] }
 0x120   : > { %v278_v32 = vadd.f32 %v276_v22, %v265_v18  ;;  %v303_v33 = vadd.f32 %v301_v23, %v290_v19  ;;  %v626_v23 = vld [vmem:[%s838_s30 + $0x118] sm:$0xff] }
 0x121   : > { %v285_v34 = vpop.permute.xlu1 %284  ;;  %v320_v25 = vpop.permute.xlu0 %319 }
 0x122   : > { %v289_v35 = vmul.f32 %v608_v24, %v285_v34  ;;  %v312_v36 = vadd.f32 %v849_v13, %v303_v33  ;;  %v325_v37 = vmul.f32 %v613_v31, %v320_v25  ;;  %v629_v24 = vld [vmem:[%s838_s30 + $0x130] sm:$0xff]  ;;  %v631_v25 = vld [vmem:[%s838_s30 + $0x140] sm:$0xff] }
 0x124   : > { %v291_v40 = vadd.f32 %v289_v35, %v278_v32  ;;  %v327_v41 = vadd.f32 %v325_v37, %v312_v36  ;;  %v628_v37 = vld [vmem:[%s838_s30 + $0x128] sm:$0xff] }
 0x125   : > { %v298_v42 = vpop.permute.xlu1 %297  ;;  %v333_v43 = vpop.permute.xlu0 %332 }
 0x126   : > { %v302_v44 = vmul.f32 %v610_v38, %v298_v42  ;;  %v338_v45 = vmul.f32 %v615_v39, %v333_v43  ;;  %v633_v38 = vld [vmem:[%s838_s30 + $0x150] sm:$0xff] }
 0x128   : > { %v304_v48 = vadd.f32 %v302_v44, %v291_v40  ;;  %v340_v49 = vadd.f32 %v338_v45, %v327_v41 }
 0x129   : > { %v322_v50 = vpop.permute.xlu1 %321  ;;  %v346_v51 = vpop.permute.xlu0 %345 }
 0x12a   : > { %v313_v13 = vadd.f32 %v860_v26, %v304_v48  ;;  %v326_v52 = vmul.f32 %v614_v46, %v322_v50  ;;  %v351_v53 = vmul.f32 %v617_v47, %v346_v51  ;;  %v630_v46 = vld [vmem:[%s838_s30 + $0x138] sm:$0xff]  ;;  %v635_v47 = vld [vmem:[%s838_s30 + $0x160] sm:$0xff] }
 0x12c   : > { %v328_v56 = vadd.f32 %v326_v52, %v313_v13  ;;  %v353_v57 = vadd.f32 %v351_v53, %v340_v49  ;;  %v632_v13 = vld [vmem:[%s838_s30 + $0x148] sm:$0xff] }
 0x12d   : > { %v335_v58 = vpop.permute.xlu1 %334  ;;  %v359_v59 = vpop.permute.xlu0 %358 }
 0x12e   : > { %v339_v60 = vmul.f32 %v616_v54, %v335_v58  ;;  %v364_v61 = vmul.f32 %v619_v55, %v359_v59  ;;  %v637_v54 = vld [vmem:[%s838_s30 + $0x170] sm:$0xff] }
 0x130   : > { %v341_v0 = vadd.f32 %v339_v60, %v328_v56  ;;  %v366_v1 = vadd.f32 %v364_v61, %v353_v57  ;;  %v437_v57 = vmul.f32 %v632_v13, %v900_v30  ;;  %v638_v30 = vld [vmem:[%s838_s30 + $0x178] sm:$0xff] }
 0x131   : > { %v348_v2 = vpop.permute.xlu1 %347  ;;  %v383_v26 = vpop.permute.xlu0 %382 }
 0x132   : > { %v352_v3 = vmul.f32 %v618_v62, %v348_v2  ;;  %v375_v4 = vadd.f32 %v862_v27, %v366_v1  ;;  %v388_v5 = vmul.f32 %v623_v63, %v383_v26  ;;  %v636_v63 = vld [vmem:[%s838_s30 + $0x168] sm:$0xff] }
 0x134   : > { %v354_v8 = vadd.f32 %v352_v3, %v341_v0  ;;  %v390_v9 = vadd.f32 %v388_v5, %v375_v4  ;;  %v639_v0 = vld [vmem:[%s838_s30 + $0x180] sm:$0xff] }
 0x135   : > { %v361_v10 = vpop.permute.xlu1 %360  ;;  %v396_v11 = vpop.permute.xlu0 %395 }
 0x136   : > { %v365_v12 = vmul.f32 %v620_v6, %v361_v10  ;;  %v401_v14 = vmul.f32 %v625_v7, %v396_v11  ;;  %v640_v10 = vld [vmem:[%s838_s30 + $0x188] sm:$0xff] }
 0x138   : > { %v367_v17 = vadd.f32 %v365_v12, %v354_v8  ;;  %v403_v18 = vadd.f32 %v401_v14, %v390_v9 }
 0x139   : > { %v385_v19 = vpop.permute.xlu1 %384  ;;  %v409_v27 = vpop.permute.xlu0 %408 }
 0x13a   : > { %v376_v20 = vadd.f32 %v864_v28, %v367_v17  ;;  %v389_v21 = vmul.f32 %v624_v15, %v385_v19  ;;  %v414_v22 = vmul.f32 %v627_v16, %v409_v27  ;;  %v436_v28 = vmul.f32 %v631_v25, %v892_v29  ;;  %v634_v29 = vld [vmem:[%s838_s30 + $0x158] sm:$0xff] }
 0x13c   : > { %v391_v31 = vadd.f32 %v389_v21, %v376_v20  ;;  %v416_v32 = vadd.f32 %v414_v22, %v403_v18 }
 0x13d   : > { %v398_v33 = vpop.permute.xlu1 %397  ;;  %v422_v34 = vpop.permute.xlu0 %421 }
 0x13e   : > { %v402_v35 = vmul.f32 %v626_v23, %v398_v33  ;;  %v427_v36 = vmul.f32 %v629_v24, %v422_v34 }
 0x140   : > { %v404_v39 = vadd.f32 %v402_v35, %v391_v31  ;;  %v429_v40 = vadd.f32 %v427_v36, %v416_v32 }
 0x141   : > { %v411_v41 = vpop.permute.xlu1 %410  ;;  %v446_v42 = vpop.permute.xlu0 %445 }
 0x142   : > { %v415_v43 = vmul.f32 %v628_v37, %v411_v41  ;;  %v438_v44 = vadd.f32 %v436_v28, %v429_v40  ;;  %v451_v45 = vmul.f32 %v633_v38, %v446_v42 }
 0x144   : > { %v417_v48 = vadd.f32 %v415_v43, %v404_v39  ;;  %v453_v49 = vadd.f32 %v451_v45, %v438_v44 }
 0x145   : > { %v424_v50 = vpop.permute.xlu1 %423  ;;  %v459_v51 = vpop.permute.xlu0 %458 }
 0x146   : > { %v428_v52 = vmul.f32 %v630_v46, %v424_v50  ;;  %v464_v53 = vmul.f32 %v635_v47, %v459_v51 }
 0x148   : > { %v430_v55 = vadd.f32 %v428_v52, %v417_v48  ;;  %v466_v56 = vadd.f32 %v464_v53, %v453_v49 }
 0x149   : > { %v448_v58 = vpop.permute.xlu1 %447  ;;  %v472_v59 = vpop.permute.xlu0 %471 }
 0x14a   : > { %v439_v60 = vadd.f32 %v437_v57, %v430_v55  ;;  %v452_v61 = vmul.f32 %v634_v29, %v448_v58  ;;  %v477_v62 = vmul.f32 %v637_v54, %v472_v59 }
 0x14c   : > { %v454_v1 = vadd.f32 %v452_v61, %v439_v60  ;;  %v479_v2 = vadd.f32 %v477_v62, %v466_v56 }
 0x14d   : > { %v461_v26 = vpop.permute.xlu1 %460  ;;  %v485_v3 = vpop.permute.xlu0 %484 }
 0x14e   : > { %v465_v4 = vmul.f32 %v636_v63, %v461_v26  ;;  %v490_v5 = vmul.f32 %v639_v0, %v485_v3 }
 0x150   : > { %v467_v6 = vadd.f32 %v465_v4, %v454_v1  ;;  %v492_v7 = vadd.f32 %v490_v5, %v479_v2 }
 0x151   : > { %v474_v8 = vpop.permute.xlu1 %473 }
 0x152   : > { %495 = vst.msk [vmem:[%s151_s14] sm:$0xff] %vm494_vm3, %v492_v7  ;;  %v478_v9 = vmul.f32 %v638_v30, %v474_v8 }
 0x154   : > { %v480_v11 = vadd.f32 %v478_v9, %v467_v6 }
 0x155   : > { %v487_v12 = vpop.permute.xlu1 %486 }
 0x156   : > { %v491_v14 = vmul.f32 %v640_v10, %v487_v12 }
 0x158   : > { %v493_v15 = vadd.f32 %v491_v14, %v480_v11 }
 0x15a   : > { %496 = vst.msk [vmem:[%s151_s14 + $0x8] sm:$0xff] %vm494_vm3, %v493_v15 }
 0x15b   : > { %709 = shalt.err (!%p706_p3)
}
 0x15c   : > { %s710_s28 = scalar_lea.hbm %s973_s23, 256  ;;  %s714_s3 = scalar_lea.hbm %s1022_s2, 3072 }
 0x15d   : > { %p711_p4 = scmp.ne.s32.totalorder %s973_s23, %s710_s28  ;;  %p715_p9 = scmp.lt.s32.totalorder %s973_s23, %s1022_s2 }
 0x15e   : > { %p716_p10 = scmp.lt.s32.totalorder %s714_s3, %s710_s28 }
 0x15f   : > { %p712_p7 = pnand %p711_p4, %p820_p5 }
 0x160   : > { %p717_p11 = por %p716_p10, %p715_p9 }
 0x161   : > { %p713_p8 = pneg %p712_p7 }
 0x163   : > { %p718_p12 = pnand %p717_p11, %p713_p8 }
 0x165   : > { %721 = shalt.err (!%p718_p12)
}
 0x166   : > { %s765_s6 = smov 128   ;;  %s766_s7 = smov 8  }
 0x167   : > { %649 = dma.vmem_to_hbm [thread:$0]  (%p820_p5), %s975_s16, 256, %s973_s23, %s980_s24, %s765_s6, %s765_s6, %s766_s7  }
 0x168 PF: > { %p655_p13 = scmp.ge.s32.totalorder %s756_s12, 2  ;;  %s526_s8 = sand.u32 1, %s744_s9  }
 0x169   : > { %s527_s14 = scalar_lea.sflag [#allocation4], %s526_s8 }
 0x16a   : > { %p652_p0 = pnand %p655_p13, %p824_p6 }
 0x16c   : > { %p653_p1 = pneg %p652_p0 }
 0x16e   : > { %739 = dma.done.wait (%p653_p1), %s527_s14, 256  }
 0x16f   : > { %741 = vsyncadd (%p653_p1), %s527_s14, 4294967040  ;;  %p12_p2 = scmp.ge.s32.totalorder %s807_s15, 14   ;;  %s1025_s9 = smov %s748_s10 }
 0x170   : > { %s1026_s10 = smov %s752_s11  ;;  %s1027_s11 = smov %s818_s18 }
 0x171   : > { %s1028_s12 = smov %s807_s15  ;;  %14 = sbr.rel (!%p12_p2) target bundleno = 3 (0x3), region = 90 }
 0x176   :  { %532 = vsyncpa [#allocation4], 1 }
 0x177   :  { %534 = vsyncpa [#allocation4 + $0x1], 1 }

</bundles_post_ra>
